<compile_context>
chip_gen: v7x
topology: tpu7x:2x2x1
jax: 0.10.0
libtpu: 0.0.40
codegen_flags: <defaults>
</compile_context>

<pallas_src>
import functools

import jax
import jax.numpy as jnp
from jax.experimental import pallas as pl
from jax.experimental.pallas import tpu as pltpu

LANE = 128
SUBLANE = 8
NEG_BIG = -1e30  # finite "-inf" for padded action logits (avoids inf-inf NaNs)


def _round_up(n, m):
    return ((n + m - 1) // m) * m


def policy_net_kernel(x_ref, w1_ref, b1_ref, w2_ref, b2_ref, out_ref):
    # One (TILE_B, 128) batch tile per grid step; weights are VMEM-resident.
    x = x_ref[...]                                              # (TB, SDp)

    # fc1 + ReLU  (padded K=128 -> single full-depth MXU pass, f32 accumulate)
    h = jnp.dot(x, w1_ref[...], preferred_element_type=jnp.float32)
    h = jnp.maximum(h + b1_ref[...], 0.0)                       # (TB, HDp)

    # fc2  (padded action columns carry a -1e30 bias)
    logits = jnp.dot(h, w2_ref[...], preferred_element_type=jnp.float32)
    logits = logits + b2_ref[...]                               # (TB, ADp)

    # Row softmax; padded columns give exp(-1e30 - m) == 0 so they drop out.
    m = jnp.max(logits, axis=-1, keepdims=True)
    e = jnp.exp(logits - m)
    denom = jnp.sum(e, axis=-1, keepdims=True)
    out_ref[...] = (e * pl.reciprocal(denom, approx=True)).astype(out_ref.dtype)


@functools.partial(jax.jit, static_argnames=("tile_b",))
def policy_net_forward(x, w1, b1, w2, b2, *, tile_b=512):
    B, S = x.shape
    H = w1.shape[1]
    A = w2.shape[1]

    SDp = _round_up(S, LANE)   # padded state dim  (lane-dense input)
    HDp = _round_up(H, LANE)   # padded hidden dim
    ADp = _round_up(A, LANE)   # padded action dim (lane-dense output)

    # Batch tiling: pick the number of tiles first, then size tiles from
    # ceil(B / n_tiles) so padding waste is < SUBLANE rows per tile.
    n_tiles = pl.cdiv(B, tile_b)
    tb = _round_up(pl.cdiv(B, n_tiles), SUBLANE)
    Bp = n_tiles * tb

    # Lane-dense padding.  (In a rollout loop the weight padding would be done
    # once outside; it is re-done here only to keep the wrapper self-contained
    # — the padded weights total ~128 KiB.)
    x_p = jnp.zeros((Bp, SDp), jnp.float32).at[:B, :S].set(x.astype(jnp.float32))
    w1_p = jnp.zeros((SDp, HDp), jnp.float32).at[:S, :H].set(w1)
    b1_p = jnp.zeros((1, HDp), jnp.float32).at[:, :H].set(b1.reshape(1, H))
    w2_p = jnp.zeros((HDp, ADp), jnp.float32).at[:H, :A].set(w2)
    b2_p = jnp.full((1, ADp), NEG_BIG, jnp.float32).at[:, :A].set(b2.reshape(1, A))

    resident = lambda i: (0, 0)  # same block every grid step -> fetched once

    probs_padded = pl.pallas_call(
        policy_net_kernel,
        out_shape=jax.ShapeDtypeStruct((Bp, ADp), jnp.float32),
        grid_spec=pltpu.PrefetchScalarGridSpec(
            num_scalar_prefetch=0,
            grid=(n_tiles,),
            in_specs=[
                pl.BlockSpec((tb, SDp), lambda i: (i, 0)),  # x: batch-tiled
                pl.BlockSpec((SDp, HDp), resident),         # w1 (resident)
                pl.BlockSpec((1, HDp), resident),           # b1 (resident)
                pl.BlockSpec((HDp, ADp), resident),         # w2 (resident)
                pl.BlockSpec((1, ADp), resident),           # b2 (resident)
            ],
            out_specs=pl.BlockSpec((tb, ADp), lambda i: (i, 0)),
        ),
        compiler_params=pltpu.CompilerParams(
            dimension_semantics=("parallel",),  # v7x: split batch over 2 TCs
        ),
    )(x_p, w1_p, b1_p, w2_p, b2_p)

    return probs_padded[:B, :A]


def init_params(key, state_dim, action_dim, hidden=64):
    # Deterministic init mimicking torch.nn.Linear default (+-1/sqrt(fan_in)).
    k1, k2, k3, k4 = jax.random.split(key, 4)
    bound1 = 1.0 / jnp.sqrt(state_dim)
    bound2 = 1.0 / jnp.sqrt(hidden)
    w1 = jax.random.uniform(k1, (state_dim, hidden), jnp.float32, -bound1, bound1)
    b1 = jax.random.uniform(k2, (1, hidden), jnp.float32, -bound1, bound1)
    w2 = jax.random.uniform(k3, (hidden, action_dim), jnp.float32, -bound2, bound2)
    b2 = jax.random.uniform(k4, (1, action_dim), jnp.float32, -bound2, bound2)
    return w1, b1, w2, b2


if __name__ == "__main__":
    key = jax.random.PRNGKey(0)
    batch, state_dim, action_dim = 8, 4, 2   # CartPole-like sizes

    kx, kp = jax.random.split(key)
    x = jax.random.normal(kx, (batch, state_dim), jnp.float32)
    w1, b1, w2, b2 = init_params(kp, state_dim, action_dim)

    probs = policy_net_forward(x, w1, b1, w2, b2)
    probs = jax.block_until_ready(probs)

    # Pure-JAX reference check.
    h_ref = jnp.maximum(x @ w1 + b1, 0.0)
    probs_ref = jax.nn.softmax(h_ref @ w2 + b2, axis=1)

    assert probs.shape == (batch, action_dim)
    # approx=True reciprocal in the kernel -> slightly looser tolerances.
    assert jnp.allclose(probs, probs_ref, atol=3e-3), "mismatch vs reference"
    assert jnp.allclose(jnp.sum(probs, axis=1), 1.0, atol=3e-3)

    print("KERNEL_OK")
</pallas_src>

<mosaic_0001>
module attributes {stable_mosaic.version = 11 : i64} {
  func.func @policy_net_kernel(%arg0: i32, %arg1: memref<8x128xf32, #tpu.memory_space<vmem>>, %arg2: memref<128x128xf32, #tpu.memory_space<vmem>>, %arg3: memref<1x128xf32, #tpu.memory_space<vmem>>, %arg4: memref<128x128xf32, #tpu.memory_space<vmem>>, %arg5: memref<1x128xf32, #tpu.memory_space<vmem>>, %arg6: memref<8x128xf32, #tpu.memory_space<vmem>>) attributes {dimension_semantics = [#tpu.dimension_semantics<parallel>], iteration_bounds = array<i64: 1>, scalar_prefetch = 0 : i64, scratch_operands = 0 : i64, tpu.core_type = #tpu.core_type<tc>, window_params = [{transform_indices = @transform_0, window_bounds = array<i64: 8, 128>}, {pipeline_mode = #tpu.pipeline_mode<synchronous>, transform_indices = @transform_1, window_bounds = array<i64: 128, 128>}, {pipeline_mode = #tpu.pipeline_mode<synchronous>, transform_indices = @transform_2, window_bounds = array<i64: 1, 128>}, {pipeline_mode = #tpu.pipeline_mode<synchronous>, transform_indices = @transform_3, window_bounds = array<i64: 128, 128>}, {pipeline_mode = #tpu.pipeline_mode<synchronous>, transform_indices = @transform_4, window_bounds = array<i64: 1, 128>}, {transform_indices = @transform_5, window_bounds = array<i64: 8, 128>}]} {
    %c0 = arith.constant 0 : index
    %c0_0 = arith.constant 0 : index
    %0 = vector.load %arg1[%c0, %c0_0] : memref<8x128xf32, #tpu.memory_space<vmem>>, vector<8x128xf32>
    %c0_1 = arith.constant 0 : index
    %c0_2 = arith.constant 0 : index
    %1 = vector.load %arg2[%c0_1, %c0_2] : memref<128x128xf32, #tpu.memory_space<vmem>>, vector<128x128xf32>
    %cst = arith.constant dense<0.000000e+00> : vector<8x128xf32>
    %2 = tpu.matmul %0, %1, %cst {dimension_numbers = #tpu.dot_dimension_numbers<[1], [0], [0], [1], [0, 0, 1, 1], [], []>} : vector<8x128xf32>, vector<128x128xf32>, vector<8x128xf32> -> vector<8x128xf32>
    %c0_3 = arith.constant 0 : index
    %c0_4 = arith.constant 0 : index
    %3 = vector.load %arg3[%c0_3, %c0_4] : memref<1x128xf32, #tpu.memory_space<vmem>>, vector<1x128xf32>
    %4 = vector.broadcast %3 : vector<1x128xf32> to vector<8x128xf32>
    %5 = arith.addf %2, %4 : vector<8x128xf32>
    %cst_5 = arith.constant 0.000000e+00 : f32
    %6 = vector.broadcast %cst_5 : f32 to vector<8x128xf32>
    %7 = arith.maximumf %5, %6 : vector<8x128xf32>
    %c0_6 = arith.constant 0 : index
    %c0_7 = arith.constant 0 : index
    %8 = vector.load %arg4[%c0_6, %c0_7] : memref<128x128xf32, #tpu.memory_space<vmem>>, vector<128x128xf32>
    %cst_8 = arith.constant dense<0.000000e+00> : vector<8x128xf32>
    %9 = tpu.matmul %7, %8, %cst_8 {dimension_numbers = #tpu.dot_dimension_numbers<[1], [0], [0], [1], [0, 0, 1, 1], [], []>} : vector<8x128xf32>, vector<128x128xf32>, vector<8x128xf32> -> vector<8x128xf32>
    %c0_9 = arith.constant 0 : index
    %c0_10 = arith.constant 0 : index
    %10 = vector.load %arg5[%c0_9, %c0_10] : memref<1x128xf32, #tpu.memory_space<vmem>>, vector<1x128xf32>
    %11 = vector.broadcast %10 : vector<1x128xf32> to vector<8x128xf32>
    %12 = arith.addf %9, %11 : vector<8x128xf32>
    %cst_11 = arith.constant dense<0xFF800000> : vector<8xf32>
    %13 = vector.multi_reduction <maximumf>, %12, %cst_11 [1] : vector<8x128xf32> to vector<8xf32>
    %14 = vector.shape_cast %13 : vector<8xf32> to vector<8x1xf32>
    %15 = vector.broadcast %14 : vector<8x1xf32> to vector<8x128xf32>
    %16 = arith.subf %12, %15 : vector<8x128xf32>
    %17 = math.exp %16 : vector<8x128xf32>
    %cst_12 = arith.constant dense<0.000000e+00> : vector<8xf32>
    %18 = vector.multi_reduction <add>, %17, %cst_12 [1] : vector<8x128xf32> to vector<8xf32>
    %19 = vector.shape_cast %18 : vector<8xf32> to vector<8x1xf32>
    %20 = tpu.reciprocal %19 {approx = true} : vector<8x1xf32> -> vector<8x1xf32>
    %21 = vector.broadcast %20 : vector<8x1xf32> to vector<8x128xf32>
    %22 = arith.mulf %17, %21 : vector<8x128xf32>
    %c0_13 = arith.constant 0 : index
    %c0_14 = arith.constant 0 : index
    %23 = vector.load %arg6[%c0_13, %c0_14] : memref<8x128xf32, #tpu.memory_space<vmem>>, vector<8x128xf32>
    tpu.vector_store %arg6[%c0_13, %c0_14], %22 {strides = array<i32>} : memref<8x128xf32, #tpu.memory_space<vmem>>, vector<8x128xf32>,
    return
  }
  func.func @transform_0(%arg0: i32) -> (i32, i32) {
    %c0_i32 = arith.constant 0 : i32
    %c0_i32_0 = arith.constant 0 : i32
    return %arg0, %c0_i32 : i32, i32
  }
  func.func @transform_1(%arg0: i32) -> (i32, i32) {
    %c0_i32 = arith.constant 0 : i32
    %c0_i32_0 = arith.constant 0 : i32
    %c0_i32_1 = arith.constant 0 : i32
    return %c0_i32, %c0_i32_0 : i32, i32
  }
  func.func @transform_2(%arg0: i32) -> (i32, i32) {
    %c0_i32 = arith.constant 0 : i32
    %c0_i32_0 = arith.constant 0 : i32
    %c0_i32_1 = arith.constant 0 : i32
    return %c0_i32, %c0_i32_0 : i32, i32
  }
  func.func @transform_3(%arg0: i32) -> (i32, i32) {
    %c0_i32 = arith.constant 0 : i32
    %c0_i32_0 = arith.constant 0 : i32
    %c0_i32_1 = arith.constant 0 : i32
    return %c0_i32, %c0_i32_0 : i32, i32
  }
  func.func @transform_4(%arg0: i32) -> (i32, i32) {
    %c0_i32 = arith.constant 0 : i32
    %c0_i32_0 = arith.constant 0 : i32
    %c0_i32_1 = arith.constant 0 : i32
    return %c0_i32, %c0_i32_0 : i32, i32
  }
  func.func @transform_5(%arg0: i32) -> (i32, i32) {
    %c0_i32 = arith.constant 0 : i32
    %c0_i32_0 = arith.constant 0 : i32
    return %arg0, %c0_i32 : i32, i32
  }
}

</mosaic_0001>

<bundles_post_ra>
// kernel: policy_net_forward.1
= control target key start
LH: loop header
LB: loop body
LE: loop exit
PB: predicated region body
PF: predicated region fallthrough
CT: control target
= control target key end

     0   :  { %v383_v0 = vmov 0.0|0.0   ;;  %vm384_vm0 = vmmov 0   ;;  %v385_v4 = vmov 0.0   ;;  %s540_s1 = inlined_call_operand.vmem [shape: f32[128,128], index: 1, kind: input, shape index: {}]   ;;  %s541_s3 = inlined_call_operand.vmem [shape: f32[128,128], index: 3, kind: input, shape index: {}]   ;;  %s542_s0 = inlined_call_operand.vmem [shape: f32[8,128], index: 0, kind: input, shape index: {}]   ;;  %s543_s2 = inlined_call_operand.vmem [shape: f32[1,128], index: 2, kind: input, shape index: {}]   ;;  %s544_s4 = inlined_call_operand.vmem [shape: f32[1,128], index: 4, kind: input, shape index: {}]   ;;  %s545_s5 = inlined_call_operand.vmem [shape: f32[8,128], index: 5, kind: output, shape index: {}]  }
   0x1   :  { %328 = vmatprep.subr.bf16.mxu0 %v383_v0  ;;  %v21_v1 = vld [vmem:[%s540_s1] sm:$0xff]  ;;  %v22_v2 = vld [vmem:[%s540_s1 + $0x8] sm:$0xff]  ;;  %v23_v3 = vld [vmem:[%s540_s1 + $0x10] sm:$0xff]  ;;  %290 = vmatprep.mubr.msk.f32.mxu0 %vm384_vm0, %v385_v4 }
   0x2   :  { %v329_v5 = vpack.c.bf16 %v22_v2, %v21_v1  ;;  %v24_v6 = vld [vmem:[%s540_s1 + $0x18] sm:$0xff]  ;;  %352 = vmatprep.subr.bf16.mxu1 %v383_v0  ;;  %325 = vmatprep.mubr.msk.f32.mxu1 %vm384_vm0, %v385_v4  ;;  %v25_v8 = vld [vmem:[%s540_s1 + $0x20] sm:$0xff]  ;;  %v26_v9 = vld [vmem:[%s540_s1 + $0x28] sm:$0xff] }
   0x3   :  { %v332_v7 = vpack.c.bf16 %v24_v6, %v23_v3  ;;  %v115_v10 = vld [vmem:[%s541_s3] sm:$0xff]  ;;  %v116_v11 = vld [vmem:[%s541_s3 + $0x8] sm:$0xff]  ;;  %v117_v12 = vld [vmem:[%s541_s3 + $0x10] sm:$0xff]  ;;  %v335_v14 = vpack.c.bf16 %v26_v9, %v25_v8 }
   0x4   :  { %330 = vmatpush3.bf16.msra.mxu0 %v329_v5  ;;  %v118_v13 = vld [vmem:[%s541_s3 + $0x18] sm:$0xff]  ;;  %v353_v15 = vpack.c.bf16 %v116_v11, %v115_v10  ;;  %v27_v16 = vld [vmem:[%s540_s1 + $0x30] sm:$0xff]  ;;  %v119_v19 = vld [vmem:[%s541_s3 + $0x20] sm:$0xff] }
   0x5   :  { %331 = vmatprep.subr.bf16.mxu0 %v383_v0  ;;  %v28_v17 = vld [vmem:[%s540_s1 + $0x38] sm:$0xff]  ;;  %v356_v18 = vpack.c.bf16 %v118_v13, %v117_v12  ;;  %v120_v20 = vld [vmem:[%s541_s3 + $0x28] sm:$0xff]  ;;  %v29_v22 = vld [vmem:[%s540_s1 + $0x40] sm:$0xff] }
   0x6   :  { %354 = vmatpush3.bf16.msra.mxu1 %v353_v15  ;;  %v338_v21 = vpack.c.bf16 %v28_v17, %v27_v16  ;;  %v30_v23 = vld [vmem:[%s540_s1 + $0x48] sm:$0xff]  ;;  %v359_v24 = vpack.c.bf16 %v120_v20, %v119_v19  ;;  %v121_v25 = vld [vmem:[%s541_s3 + $0x30] sm:$0xff]  ;;  %v122_v26 = vld [vmem:[%s541_s3 + $0x38] sm:$0xff] }
   0x7   :  { %355 = vmatprep.subr.bf16.mxu1 %v383_v0  ;;  %v341_v27 = vpack.c.bf16 %v30_v23, %v29_v22  ;;  %v31_v28 = vld [vmem:[%s540_s1 + $0x50] sm:$0xff]  ;;  %v32_v29 = vld [vmem:[%s540_s1 + $0x58] sm:$0xff]  ;;  %v362_v30 = vpack.c.bf16 %v122_v26, %v121_v25  ;;  %v123_v31 = vld [vmem:[%s541_s3 + $0x40] sm:$0xff] }
   0x8   :  { %333 = vmatpush3.bf16.msra.mxu0 %v332_v7  ;;  %v124_v32 = vld [vmem:[%s541_s3 + $0x48] sm:$0xff]  ;;  %v344_v33 = vpack.c.bf16 %v32_v29, %v31_v28  ;;  %v33_v34 = vld [vmem:[%s540_s1 + $0x60] sm:$0xff]  ;;  %v125_v37 = vld [vmem:[%s541_s3 + $0x50] sm:$0xff] }
   0x9   :  { %334 = vmatprep.subr.bf16.mxu0 %v383_v0  ;;  %v34_v35 = vld [vmem:[%s540_s1 + $0x68] sm:$0xff]  ;;  %v365_v36 = vpack.c.bf16 %v124_v32, %v123_v31  ;;  %v126_v38 = vld [vmem:[%s541_s3 + $0x58] sm:$0xff]  ;;  %v35_v40 = vld [vmem:[%s540_s1 + $0x70] sm:$0xff] }
   0xa   :  { %357 = vmatpush3.bf16.msra.mxu1 %v356_v18  ;;  %v347_v39 = vpack.c.bf16 %v34_v35, %v33_v34  ;;  %v36_v41 = vld [vmem:[%s540_s1 + $0x78] sm:$0xff]  ;;  %v368_v42 = vpack.c.bf16 %v126_v38, %v125_v37  ;;  %v127_v43 = vld [vmem:[%s541_s3 + $0x60] sm:$0xff]  ;;  %v128_v44 = vld [vmem:[%s541_s3 + $0x68] sm:$0xff] }
   0xb   :  { %358 = vmatprep.subr.bf16.mxu1 %v383_v0  ;;  %v350_v45 = vpack.c.bf16 %v36_v41, %v35_v40  ;;  %v371_v46 = vpack.c.bf16 %v128_v44, %v127_v43  ;;  %v20_v47 = vld [vmem:[%s542_s0] sm:$0xff]  ;;  %v129_v48 = vld [vmem:[%s541_s3 + $0x70] sm:$0xff]  ;;  %v130_v49 = vld [vmem:[%s541_s3 + $0x78] sm:$0xff] }
   0xc   :  { %336 = vmatpush3.bf16.msra.mxu0 %v335_v14  ;;  %v374_v50 = vpack.c.bf16 %v130_v49, %v129_v48  ;;  %v222_v51 = vld [vmem:[%s543_s2] ss:$0 sm:$0xff] }
   0xd   :  { %337 = vmatprep.subr.bf16.mxu0 %v383_v0  ;;  %v223_v56 = vld [vmem:[%s544_s4] ss:$0 sm:$0xff] }
   0xe   :  { %360 = vmatpush3.bf16.msra.mxu1 %v359_v24 }
   0xf   :  { %361 = vmatprep.subr.bf16.mxu1 %v383_v0 }
  0x10   :  { %339 = vmatpush3.bf16.msra.mxu0 %v338_v21 }
  0x11   :  { %340 = vmatprep.subr.bf16.mxu0 %v383_v0 }
  0x12   :  { %363 = vmatpush3.bf16.msra.mxu1 %v362_v30 }
  0x13   :  { %364 = vmatprep.subr.bf16.mxu1 %v383_v0 }
  0x14   :  { %342 = vmatpush3.bf16.msra.mxu0 %v341_v27 }
  0x15   :  { %343 = vmatprep.subr.bf16.mxu0 %v383_v0 }
  0x16   :  { %366 = vmatpush3.bf16.msra.mxu1 %v365_v36 }
  0x17   :  { %367 = vmatprep.subr.bf16.mxu1 %v383_v0 }
  0x18   :  { %345 = vmatpush3.bf16.msra.mxu0 %v344_v33 }
  0x19   :  { %346 = vmatprep.subr.bf16.mxu0 %v383_v0 }
  0x1a   :  { %369 = vmatpush3.bf16.msra.mxu1 %v368_v42 }
  0x1b   :  { %370 = vmatprep.subr.bf16.mxu1 %v383_v0 }
  0x1c   :  { %348 = vmatpush3.bf16.msra.mxu0 %v347_v39 }
  0x1d   :  { %349 = vmatprep.subr.bf16.mxu0 %v383_v0 }
  0x1e   :  { %372 = vmatpush3.bf16.msra.mxu1 %v371_v46 }
  0x1f   :  { %373 = vmatprep.subr.bf16.mxu1 %v383_v0 }
  0x20   :  { %351 = vmatpush3.bf16.msra.mxu0 %v350_v45 }
  0x22   :  { %375 = vmatpush3.bf16.msra.mxu1 %v374_v50 }
  0x23   :  { %291 = vmatmul.mubr.f32.vlgmr.msra.gmra.mrb[0].mxu0 %v20_v47 }
  0xf6   :  { %v110_v52 = vpop.f32.mrb[0].mxu0 }
  0xf7   :  { %v111_v53 = vadd.f32 %v222_v51, %v110_v52  ;;  %v292_v54 = vpop.f32.mrb[1].mxu0 }
  0xf9   :  { %v114_v55 = vmax.f32 %v111_v53, 0.0 }
  0xfb   :  { %326 = vmatmul.mubr.f32.vlgmr.msra.gmra.mrb[0].mxu1 %v114_v55 }
 0x1ce   :  { %v204_v57 = vpop.f32.mrb[0].mxu1 }
 0x1cf   :  { %v205_v58 = vadd.f32 %v223_v56, %v204_v57  ;;  %v327_v59 = vpop.f32.mrb[1].mxu1 }
 0x1d1   :  { %208 = vmax.xlane.f32.xlu0 %v205_v58 }
 0x25e   :  { %v209_v60 = vpop.xlane.xlu0 %208 }
 0x25f   :  { %v210_v61 = vsub.f32 %v205_v58, %v209_v60 }
 0x261   :  { %v211_v62 = vmul.f32 1.442695, %v210_v61 }
 0x263   :  { %379 = vpow2.f32 %v211_v62 }
 0x26d   :  { %v380_v63 = vpop.eup %379 }
 0x26e   :  { %213 = vadd.xlane.f32.xlu0 %v380_v63 }
 0x2fb   :  { %v214_v0 = vpop.xlane.xlu0 %213 }
 0x2fc   :  { %381 = vrcp.f32 %v214_v0 }
 0x306   :  { %v382_v1 = vpop.eup %381 }
 0x307   :  { %v216_v2 = vmul.f32 %v382_v1, %v380_v63 }
 0x309   :  { %217 = vst [vmem:[%s545_s5] sm:$0xff] %v216_v2 }

</bundles_post_ra>
